<compile_context>
chip_gen: v6e
topology: v6e:2x2x1
jax: 0.10.0
libtpu: 0.0.40
codegen_flags: <defaults>
</compile_context>

<pallas_src>
import jax
import jax.numpy as jnp
from jax.experimental import pallas as pl
from jax.experimental.pallas import tpu as pltpu


# ---------------------------------------------------------------------------
# In-kernel helpers
# ---------------------------------------------------------------------------

def _pool_step(x, f, sum_ref, max_ref):
    """Accumulate per-channel sum/max of one (C, HW) frame into (C, 1) scratch."""
    xf = x.astype(jnp.float32)
    col_s = jnp.sum(xf, axis=1, keepdims=True)   # (C, 1) lane reduce
    col_m = jnp.max(xf, axis=1, keepdims=True)   # (C, 1)

    @pl.when(f == 0)
    def _init():
        sum_ref[...] = col_s
        max_ref[...] = col_m

    @pl.when(f > 0)
    def _acc():
        sum_ref[...] = sum_ref[...] + col_s
        max_ref[...] = jnp.maximum(max_ref[...], col_m)


def _shared_mlp(p, w1t, w2):
    """p: (C, 1) pooled column.  w1t = W1.T: (C, Hid).  w2 = W2: (C, Hid).
    Returns (C, 1) = W2 @ relu(W1 @ p), computed with VPU broadcasts + tiny
    sublane reductions (no MXU round-trip)."""
    hid = w1t.shape[1]
    o = jnp.zeros_like(p)
    for j in range(hid):                               # Hid is tiny & static
        hj = jnp.maximum(
            jnp.sum(w1t[:, j:j + 1] * p, axis=0, keepdims=True), 0.0)   # (1, 1)
        o = o + w2[:, j:j + 1] * hj                                      # (C, 1)
    return o


def _channel_attention(sum_ref, max_ref, w1t, w2, inv_n):
    avg = sum_ref[...] * inv_n                         # (C, 1)
    mx = max_ref[...]                                  # (C, 1)
    return jax.nn.sigmoid(_shared_mlp(avg, w1t, w2) + _shared_mlp(mx, w1t, w2))


# ---------------------------------------------------------------------------
# Kernels
# ---------------------------------------------------------------------------

def ca_apply_kernel(x_ref, w1t_ref, w2_ref, out_ref, sum_ref, max_ref):
    # x_ref:   (C, HW)      one time-frame of one batch element (lane dim = HW)
    # w1t_ref: (C, Hid)     W1.T
    # w2_ref:  (C, Hid)     W2
    # out_ref: (F, C, HW)   resident output block for this batch element
    # sum_ref, max_ref: (C, 1) f32 scratch accumulators
    f = pl.program_id(1)
    n_f = out_ref.shape[0]          # static F
    hw = x_ref.shape[-1]

    x = x_ref[...]                                      # (C, HW)
    _pool_step(x, f, sum_ref, max_ref)

    # Stage the incoming frame into the resident output block.
    out_ref[f] = x

    @pl.when(f == n_f - 1)
    def _finalize():
        attn = _channel_attention(sum_ref, max_ref, w1t_ref[...], w2_ref[...],
                                  1.0 / (n_f * hw))     # (C, 1)

        # In-place scale + ReLU over the resident block, one frame at a time so
        # vreg live ranges stay bounded for large F.
        def body(ff, carry):
            blk = out_ref[ff]                           # (C, HW)
            out_ref[ff] = jnp.maximum(blk * attn, 0.0).astype(out_ref.dtype)
            return carry

        jax.lax.fori_loop(0, n_f, body, 0, unroll=True)


def ca_pool_kernel(x_ref, w1t_ref, w2_ref, attn_ref, sum_ref, max_ref):
    # Pooling-only path (fbs=True): never touches / writes the big output.
    f = pl.program_id(1)
    n_f = pl.num_programs(1)
    hw = x_ref.shape[-1]

    _pool_step(x_ref[...], f, sum_ref, max_ref)

    @pl.when(f == n_f - 1)
    def _finalize():
        attn = _channel_attention(sum_ref, max_ref, w1t_ref[...], w2_ref[...],
                                  1.0 / (n_f * hw))     # (C, 1)
        attn_ref[...] = attn.astype(attn_ref.dtype)


# ---------------------------------------------------------------------------
# Wrapper
# ---------------------------------------------------------------------------

def _vmem_limit_bytes(F, C, HW, itemsize=4):
    c_pad = -(-C // 8) * 8
    hw_pad = -(-HW // 128) * 128
    slab = F * c_pad * hw_pad * itemsize      # resident output block
    frame = c_pad * hw_pad * itemsize         # one streamed input frame
    need = 2 * slab + 4 * frame + (2 << 20)   # out (x2) + double-buffered in + headroom
    # Floor well under every generation's default; cap below v7x's 64 MiB physical.
    return int(min(max(need, 16 << 20), 56 << 20))


def ca_forward(x, w1, w2, fbs=False):
    """x: (B, F, C, H, W) float32.  w1: (Hid, C), w2: (C, Hid) — the 1x1x1 conv weights."""
    B, F, C, H, W = x.shape
    HW = H * W
    Hid = w1.shape[0]

    x_k = x.reshape(B, F, C, HW)        # free reshape, no transpose / extra HBM pass
    w1t = jnp.transpose(w1)             # (C, Hid)   tiny
    # w2 is already (C, Hid)

    vmem_limit = _vmem_limit_bytes(F, C, HW, x.dtype.itemsize)

    common_in_specs = [
        pl.BlockSpec((None, None, C, HW), lambda b, f: (b, f, 0, 0)),   # (C, HW) frame
        pl.BlockSpec((C, Hid), lambda b, f: (0, 0)),
        pl.BlockSpec((C, Hid), lambda b, f: (0, 0)),
    ]
    scratch = [pltpu.VMEM((C, 1), jnp.float32),    # running sum
               pltpu.VMEM((C, 1), jnp.float32)]    # running max
    cparams = pltpu.CompilerParams(
        dimension_semantics=("parallel", "arbitrary"),
        vmem_limit_bytes=vmem_limit,
    )

    if fbs:
        # Attention-map-only path: no big output computed or written.
        attn = pl.pallas_call(
            ca_pool_kernel,
            out_shape=jax.ShapeDtypeStruct((B, C, 1), x.dtype),
            grid_spec=pltpu.PrefetchScalarGridSpec(
                num_scalar_prefetch=0,
                grid=(B, F),
                in_specs=common_in_specs,
                out_specs=pl.BlockSpec((None, C, 1), lambda b, f: (b, 0, 0)),
                scratch_shapes=scratch,
            ),
            compiler_params=cparams,
        )(x_k, w1t, w2)
        # ChannelAttention returns shape (B, 1, C, 1, 1) after its rearrange.
        return attn.reshape(B, 1, C, 1, 1)

    out = pl.pallas_call(
        ca_apply_kernel,
        out_shape=jax.ShapeDtypeStruct((B, F, C, HW), x.dtype),
        grid_spec=pltpu.PrefetchScalarGridSpec(
            num_scalar_prefetch=0,
            grid=(B, F),
            in_specs=common_in_specs,
            out_specs=pl.BlockSpec((None, F, C, HW), lambda b, f: (b, 0, 0, 0)),
            scratch_shapes=scratch,
        ),
        compiler_params=cparams,
    )(x_k, w1t, w2)

    return out.reshape(B, F, C, H, W)   # free reshape back


# ---------------------------------------------------------------------------
# Pure-JAX reference (mirrors the PyTorch forward)
# ---------------------------------------------------------------------------

def ca_reference(x, w1, w2):
    xc = jnp.transpose(x, (0, 2, 1, 3, 4))          # b c f h w
    avg = jnp.mean(xc, axis=(2, 3, 4))              # (B, C)
    mx = jnp.max(xc, axis=(2, 3, 4))                # (B, C)

    def mlp(v):
        return jnp.maximum(v @ w1.T, 0.0) @ w2.T

    attn = jax.nn.sigmoid(mlp(avg) + mlp(mx))       # (B, C)
    out = jnp.maximum(attn[:, None, :, None, None] * x, 0.0)
    return out, attn


if __name__ == "__main__":
    # Small shapes consistent with the module: CA(timeWindows=8, channels=10, c_ratio=5)
    B, F, C, H, W = 2, 8, 10, 16, 16
    ratio = 5
    Hid = C // ratio

    key = jax.random.PRNGKey(0)
    kx, k1, k2 = jax.random.split(key, 3)

    x = jax.random.normal(kx, (B, F, C, H, W), dtype=jnp.float32)
    # Conv3d(C, C//ratio, 1, bias=False) weight -> (Hid, C); second conv -> (C, Hid)
    w1 = 0.3 * jax.random.normal(k1, (Hid, C), dtype=jnp.float32)
    w2 = 0.3 * jax.random.normal(k2, (C, Hid), dtype=jnp.float32)

    out = jax.block_until_ready(ca_forward(x, w1, w2, fbs=False))
    attn_map = jax.block_until_ready(ca_forward(x, w1, w2, fbs=True))

    ref_out, ref_attn = ca_reference(x, w1, w2)
    assert out.shape == ref_out.shape == (B, F, C, H, W)
    assert attn_map.shape == (B, 1, C, 1, 1)
    assert jnp.allclose(out, ref_out, rtol=1e-5, atol=1e-5), "output mismatch vs reference"
    assert jnp.allclose(attn_map.reshape(B, C), ref_attn, rtol=1e-5, atol=1e-5), \
        "attention mismatch vs reference"

    print("KERNEL_OK")
</pallas_src>

<mosaic_0001>
module attributes {stable_mosaic.version = 11 : i64} {
  func.func @ca_apply_kernel(%arg0: i32, %arg1: i32, %arg2: memref<1x1x10x256xf32, #tpu.memory_space<vmem>>, %arg3: memref<10x2xf32, #tpu.memory_space<vmem>>, %arg4: memref<10x2xf32, #tpu.memory_space<vmem>>, %arg5: memref<1x8x10x256xf32, #tpu.memory_space<vmem>>, %arg6: memref<10x1xf32, #tpu.memory_space<vmem>>, %arg7: memref<10x1xf32, #tpu.memory_space<vmem>>) attributes {dimension_semantics = [#tpu.dimension_semantics<parallel>, #tpu.dimension_semantics<arbitrary>], iteration_bounds = array<i64: 2, 8>, scalar_prefetch = 0 : i64, scratch_operands = 2 : i64, tpu.core_type = #tpu.core_type<tc>, window_params = [{transform_indices = @transform_0, window_bounds = array<i64: 1, 1, 10, 256>}, {pipeline_mode = #tpu.pipeline_mode<synchronous>, transform_indices = @transform_1, window_bounds = array<i64: 10, 2>}, {pipeline_mode = #tpu.pipeline_mode<synchronous>, transform_indices = @transform_2, window_bounds = array<i64: 10, 2>}, {transform_indices = @transform_3, window_bounds = array<i64: 1, 8, 10, 256>}]} {
    %c0 = arith.constant 0 : index
    %c0_0 = arith.constant 0 : index
    %c0_1 = arith.constant 0 : index
    %c0_2 = arith.constant 0 : index
    %0 = vector.load %arg2[%c0, %c0_0, %c0_1, %c0_2] : memref<1x1x10x256xf32, #tpu.memory_space<vmem>>, vector<1x1x10x256xf32>
    %1 = vector.shape_cast %0 : vector<1x1x10x256xf32> to vector<10x256xf32>
    %cst = arith.constant dense<0.000000e+00> : vector<10xf32>
    %2 = vector.multi_reduction <add>, %1, %cst [1] : vector<10x256xf32> to vector<10xf32>
    %3 = vector.shape_cast %2 : vector<10xf32> to vector<10x1xf32>
    %cst_3 = arith.constant dense<0xFF800000> : vector<10xf32>
    %4 = vector.multi_reduction <maximumf>, %1, %cst_3 [1] : vector<10x256xf32> to vector<10xf32>
    %5 = vector.shape_cast %4 : vector<10xf32> to vector<10x1xf32>
    %c0_i32 = arith.constant 0 : i32
    %6 = arith.cmpi eq, %arg1, %c0_i32 : i32
    %7 = arith.extui %6 : i1 to i32
    %c0_i32_4 = arith.constant 0 : i32
    %8 = arith.cmpi ne, %7, %c0_i32_4 : i32
    scf.if %8 {
      %c0_11 = arith.constant 0 : index
      %c0_12 = arith.constant 0 : index
      %19 = vector.load %arg6[%c0_11, %c0_12] : memref<10x1xf32, #tpu.memory_space<vmem>>, vector<10x1xf32>
      tpu.vector_store %arg6[%c0_11, %c0_12], %3 {strides = array<i32>} : memref<10x1xf32, #tpu.memory_space<vmem>>, vector<10x1xf32>,
      %c0_13 = arith.constant 0 : index
      %c0_14 = arith.constant 0 : index
      %20 = vector.load %arg7[%c0_13, %c0_14] : memref<10x1xf32, #tpu.memory_space<vmem>>, vector<10x1xf32>
      tpu.vector_store %arg7[%c0_13, %c0_14], %5 {strides = array<i32>} : memref<10x1xf32, #tpu.memory_space<vmem>>, vector<10x1xf32>,
    } else {
    }
    %c0_i32_5 = arith.constant 0 : i32
    %9 = arith.cmpi sgt, %arg1, %c0_i32_5 : i32
    %10 = arith.extui %9 : i1 to i32
    %c0_i32_6 = arith.constant 0 : i32
    %11 = arith.cmpi ne, %10, %c0_i32_6 : i32
    scf.if %11 {
      %c0_11 = arith.constant 0 : index
      %c0_12 = arith.constant 0 : index
      %19 = vector.load %arg6[%c0_11, %c0_12] : memref<10x1xf32, #tpu.memory_space<vmem>>, vector<10x1xf32>
      %20 = arith.addf %19, %3 : vector<10x1xf32>
      %c0_13 = arith.constant 0 : index
      %c0_14 = arith.constant 0 : index
      %21 = vector.load %arg6[%c0_13, %c0_14] : memref<10x1xf32, #tpu.memory_space<vmem>>, vector<10x1xf32>
      tpu.vector_store %arg6[%c0_13, %c0_14], %20 {strides = array<i32>} : memref<10x1xf32, #tpu.memory_space<vmem>>, vector<10x1xf32>,
      %c0_15 = arith.constant 0 : index
      %c0_16 = arith.constant 0 : index
      %22 = vector.load %arg7[%c0_15, %c0_16] : memref<10x1xf32, #tpu.memory_space<vmem>>, vector<10x1xf32>
      %23 = arith.maximumf %22, %5 : vector<10x1xf32>
      %c0_17 = arith.constant 0 : index
      %c0_18 = arith.constant 0 : index
      %24 = vector.load %arg7[%c0_17, %c0_18] : memref<10x1xf32, #tpu.memory_space<vmem>>, vector<10x1xf32>
      tpu.vector_store %arg7[%c0_17, %c0_18], %23 {strides = array<i32>} : memref<10x1xf32, #tpu.memory_space<vmem>>, vector<10x1xf32>,
    } else {
    }
    %c0_7 = arith.constant 0 : index
    %12 = arith.index_cast %arg1 : i32 to index
    %c0_8 = arith.constant 0 : index
    %c0_9 = arith.constant 0 : index
    %13 = vector.load %arg5[%c0_7, %12, %c0_8, %c0_9] : memref<1x8x10x256xf32, #tpu.memory_space<vmem>>, vector<1x1x10x256xf32>
    %14 = vector.shape_cast %13 : vector<1x1x10x256xf32> to vector<10x256xf32>
    %15 = vector.shape_cast %1 : vector<10x256xf32> to vector<1x1x10x256xf32>
    tpu.vector_store %arg5[%c0_7, %12, %c0_8, %c0_9], %15 {strides = array<i32>} : memref<1x8x10x256xf32, #tpu.memory_space<vmem>>, vector<1x1x10x256xf32>,
    %c7_i32 = arith.constant 7 : i32
    %16 = arith.cmpi eq, %arg1, %c7_i32 : i32
    %17 = arith.extui %16 : i1 to i32
    %c0_i32_10 = arith.constant 0 : i32
    %18 = arith.cmpi ne, %17, %c0_i32_10 : i32
    scf.if %18 {
      %c0_11 = arith.constant 0 : index
      %c0_12 = arith.constant 0 : index
      %19 = vector.load %arg3[%c0_11, %c0_12] : memref<10x2xf32, #tpu.memory_space<vmem>>, vector<10x2xf32>
      %c0_13 = arith.constant 0 : index
      %c0_14 = arith.constant 0 : index
      %20 = vector.load %arg4[%c0_13, %c0_14] : memref<10x2xf32, #tpu.memory_space<vmem>>, vector<10x2xf32>
      %c0_15 = arith.constant 0 : index
      %c0_16 = arith.constant 0 : index
      %21 = vector.load %arg6[%c0_15, %c0_16] : memref<10x1xf32, #tpu.memory_space<vmem>>, vector<10x1xf32>
      %cst_17 = arith.constant 4.8828125E-4 : f32
      %22 = vector.broadcast %cst_17 : f32 to vector<10x1xf32>
      %23 = arith.mulf %21, %22 : vector<10x1xf32>
      %c0_18 = arith.constant 0 : index
      %c0_19 = arith.constant 0 : index
      %24 = vector.load %arg7[%c0_18, %c0_19] : memref<10x1xf32, #tpu.memory_space<vmem>>, vector<10x1xf32>
      %cst_20 = arith.constant 0.000000e+00 : f32
      %25 = vector.broadcast %cst_20 : f32 to vector<10x1xf32>
      %26 = vector.extract_strided_slice %19 {offsets = [0, 0], sizes = [10, 1], strides = [1, 1]} : vector<10x2xf32> to vector<10x1xf32>
      %27 = arith.mulf %26, %23 : vector<10x1xf32>
      %cst_21 = arith.constant dense<0.000000e+00> : vector<1xf32>
      %28 = vector.multi_reduction <add>, %27, %cst_21 [0] : vector<10x1xf32> to vector<1xf32>
      %29 = vector.shape_cast %28 : vector<1xf32> to vector<1x1xf32>
      %cst_22 = arith.constant 0.000000e+00 : f32
      %30 = vector.broadcast %cst_22 : f32 to vector<1x1xf32>
      %31 = arith.maximumf %29, %30 : vector<1x1xf32>
      %32 = vector.extract_strided_slice %20 {offsets = [0, 0], sizes = [10, 1], strides = [1, 1]} : vector<10x2xf32> to vector<10x1xf32>
      %33 = vector.broadcast %31 : vector<1x1xf32> to vector<10x1xf32>
      %34 = arith.mulf %32, %33 : vector<10x1xf32>
      %35 = arith.addf %25, %34 : vector<10x1xf32>
      %36 = vector.extract_strided_slice %19 {offsets = [0, 1], sizes = [10, 1], strides = [1, 1]} : vector<10x2xf32> to vector<10x1xf32>
      %37 = arith.mulf %36, %23 : vector<10x1xf32>
      %cst_23 = arith.constant dense<0.000000e+00> : vector<1xf32>
      %38 = vector.multi_reduction <add>, %37, %cst_23 [0] : vector<10x1xf32> to vector<1xf32>
      %39 = vector.shape_cast %38 : vector<1xf32> to vector<1x1xf32>
      %cst_24 = arith.constant 0.000000e+00 : f32
      %40 = vector.broadcast %cst_24 : f32 to vector<1x1xf32>
      %41 = arith.maximumf %39, %40 : vector<1x1xf32>
      %42 = vector.extract_strided_slice %20 {offsets = [0, 1], sizes = [10, 1], strides = [1, 1]} : vector<10x2xf32> to vector<10x1xf32>
      %43 = vector.broadcast %41 : vector<1x1xf32> to vector<10x1xf32>
      %44 = arith.mulf %42, %43 : vector<10x1xf32>
      %45 = arith.addf %35, %44 : vector<10x1xf32>
      %cst_25 = arith.constant 0.000000e+00 : f32
      %46 = vector.broadcast %cst_25 : f32 to vector<10x1xf32>
      %47 = vector.extract_strided_slice %19 {offsets = [0, 0], sizes = [10, 1], strides = [1, 1]} : vector<10x2xf32> to vector<10x1xf32>
      %48 = arith.mulf %47, %24 : vector<10x1xf32>
      %cst_26 = arith.constant dense<0.000000e+00> : vector<1xf32>
      %49 = vector.multi_reduction <add>, %48, %cst_26 [0] : vector<10x1xf32> to vector<1xf32>
      %50 = vector.shape_cast %49 : vector<1xf32> to vector<1x1xf32>
      %cst_27 = arith.constant 0.000000e+00 : f32
      %51 = vector.broadcast %cst_27 : f32 to vector<1x1xf32>
      %52 = arith.maximumf %50, %51 : vector<1x1xf32>
      %53 = vector.extract_strided_slice %20 {offsets = [0, 0], sizes = [10, 1], strides = [1, 1]} : vector<10x2xf32> to vector<10x1xf32>
      %54 = vector.broadcast %52 : vector<1x1xf32> to vector<10x1xf32>
      %55 = arith.mulf %53, %54 : vector<10x1xf32>
      %56 = arith.addf %46, %55 : vector<10x1xf32>
      %57 = vector.extract_strided_slice %19 {offsets = [0, 1], sizes = [10, 1], strides = [1, 1]} : vector<10x2xf32> to vector<10x1xf32>
      %58 = arith.mulf %57, %24 : vector<10x1xf32>
      %cst_28 = arith.constant dense<0.000000e+00> : vector<1xf32>
      %59 = vector.multi_reduction <add>, %58, %cst_28 [0] : vector<10x1xf32> to vector<1xf32>
      %60 = vector.shape_cast %59 : vector<1xf32> to vector<1x1xf32>
      %cst_29 = arith.constant 0.000000e+00 : f32
      %61 = vector.broadcast %cst_29 : f32 to vector<1x1xf32>
      %62 = arith.maximumf %60, %61 : vector<1x1xf32>
      %63 = vector.extract_strided_slice %20 {offsets = [0, 1], sizes = [10, 1], strides = [1, 1]} : vector<10x2xf32> to vector<10x1xf32>
      %64 = vector.broadcast %62 : vector<1x1xf32> to vector<10x1xf32>
      %65 = arith.mulf %63, %64 : vector<10x1xf32>
      %66 = arith.addf %56, %65 : vector<10x1xf32>
      %67 = arith.addf %45, %66 : vector<10x1xf32>
      %68 = arith.negf %67 : vector<10x1xf32>
      %69 = math.exp %68 : vector<10x1xf32>
      %cst_30 = arith.constant 1.000000e+00 : f32
      %70 = vector.broadcast %cst_30 : f32 to vector<10x1xf32>
      %71 = arith.addf %70, %69 : vector<10x1xf32>
      %72 = arith.divf %70, %71 : vector<10x1xf32>
      %c0_i32_31 = arith.constant 0 : i32
      %c0_32 = arith.constant 0 : index
      %73 = arith.index_cast %c0_i32_31 : i32 to index
      %c0_33 = arith.constant 0 : index
      %c0_34 = arith.constant 0 : index
      %74 = vector.load %arg5[%c0_32, %73, %c0_33, %c0_34] : memref<1x8x10x256xf32, #tpu.memory_space<vmem>>, vector<1x1x10x256xf32>
      %75 = vector.shape_cast %74 : vector<1x1x10x256xf32> to vector<10x256xf32>
      %76 = vector.broadcast %72 : vector<10x1xf32> to vector<10x256xf32>
      %77 = arith.mulf %75, %76 : vector<10x256xf32>
      %cst_35 = arith.constant 0.000000e+00 : f32
      %78 = vector.broadcast %cst_35 : f32 to vector<10x256xf32>
      %79 = arith.maximumf %77, %78 : vector<10x256xf32>
      %c0_36 = arith.constant 0 : index
      %80 = arith.index_cast %c0_i32_31 : i32 to index
      %c0_37 = arith.constant 0 : index
      %c0_38 = arith.constant 0 : index
      %81 = vector.load %arg5[%c0_36, %80, %c0_37, %c0_38] : memref<1x8x10x256xf32, #tpu.memory_space<vmem>>, vector<1x1x10x256xf32>
      %82 = vector.shape_cast %81 : vector<1x1x10x256xf32> to vector<10x256xf32>
      %83 = vector.shape_cast %79 : vector<10x256xf32> to vector<1x1x10x256xf32>
      tpu.vector_store %arg5[%c0_36, %80, %c0_37, %c0_38], %83 {strides = array<i32>} : memref<1x8x10x256xf32, #tpu.memory_space<vmem>>, vector<1x1x10x256xf32>,
      %c1_i32 = arith.constant 1 : i32
      %c0_39 = arith.constant 0 : index
      %84 = arith.index_cast %c1_i32 : i32 to index
      %c0_40 = arith.constant 0 : index
      %c0_41 = arith.constant 0 : index
      %85 = vector.load %arg5[%c0_39, %84, %c0_40, %c0_41] : memref<1x8x10x256xf32, #tpu.memory_space<vmem>>, vector<1x1x10x256xf32>
      %86 = vector.shape_cast %85 : vector<1x1x10x256xf32> to vector<10x256xf32>
      %87 = vector.broadcast %72 : vector<10x1xf32> to vector<10x256xf32>
      %88 = arith.mulf %86, %87 : vector<10x256xf32>
      %cst_42 = arith.constant 0.000000e+00 : f32
      %89 = vector.broadcast %cst_42 : f32 to vector<10x256xf32>
      %90 = arith.maximumf %88, %89 : vector<10x256xf32>
      %c0_43 = arith.constant 0 : index
      %91 = arith.index_cast %c1_i32 : i32 to index
      %c0_44 = arith.constant 0 : index
      %c0_45 = arith.constant 0 : index
      %92 = vector.load %arg5[%c0_43, %91, %c0_44, %c0_45] : memref<1x8x10x256xf32, #tpu.memory_space<vmem>>, vector<1x1x10x256xf32>
      %93 = vector.shape_cast %92 : vector<1x1x10x256xf32> to vector<10x256xf32>
      %94 = vector.shape_cast %90 : vector<10x256xf32> to vector<1x1x10x256xf32>
      tpu.vector_store %arg5[%c0_43, %91, %c0_44, %c0_45], %94 {strides = array<i32>} : memref<1x8x10x256xf32, #tpu.memory_space<vmem>>, vector<1x1x10x256xf32>,
      %c2_i32 = arith.constant 2 : i32
      %c0_46 = arith.constant 0 : index
      %95 = arith.index_cast %c2_i32 : i32 to index
      %c0_47 = arith.constant 0 : index
      %c0_48 = arith.constant 0 : index
      %96 = vector.load %arg5[%c0_46, %95, %c0_47, %c0_48] : memref<1x8x10x256xf32, #tpu.memory_space<vmem>>, vector<1x1x10x256xf32>
      %97 = vector.shape_cast %96 : vector<1x1x10x256xf32> to vector<10x256xf32>
      %98 = vector.broadcast %72 : vector<10x1xf32> to vector<10x256xf32>
      %99 = arith.mulf %97, %98 : vector<10x256xf32>
      %cst_49 = arith.constant 0.000000e+00 : f32
      %100 = vector.broadcast %cst_49 : f32 to vector<10x256xf32>
      %101 = arith.maximumf %99, %100 : vector<10x256xf32>
      %c0_50 = arith.constant 0 : index
      %102 = arith.index_cast %c2_i32 : i32 to index
      %c0_51 = arith.constant 0 : index
      %c0_52 = arith.constant 0 : index
      %103 = vector.load %arg5[%c0_50, %102, %c0_51, %c0_52] : memref<1x8x10x256xf32, #tpu.memory_space<vmem>>, vector<1x1x10x256xf32>
      %104 = vector.shape_cast %103 : vector<1x1x10x256xf32> to vector<10x256xf32>
      %105 = vector.shape_cast %101 : vector<10x256xf32> to vector<1x1x10x256xf32>
      tpu.vector_store %arg5[%c0_50, %102, %c0_51, %c0_52], %105 {strides = array<i32>} : memref<1x8x10x256xf32, #tpu.memory_space<vmem>>, vector<1x1x10x256xf32>,
      %c3_i32 = arith.constant 3 : i32
      %c0_53 = arith.constant 0 : index
      %106 = arith.index_cast %c3_i32 : i32 to index
      %c0_54 = arith.constant 0 : index
      %c0_55 = arith.constant 0 : index
      %107 = vector.load %arg5[%c0_53, %106, %c0_54, %c0_55] : memref<1x8x10x256xf32, #tpu.memory_space<vmem>>, vector<1x1x10x256xf32>
      %108 = vector.shape_cast %107 : vector<1x1x10x256xf32> to vector<10x256xf32>
      %109 = vector.broadcast %72 : vector<10x1xf32> to vector<10x256xf32>
      %110 = arith.mulf %108, %109 : vector<10x256xf32>
      %cst_56 = arith.constant 0.000000e+00 : f32
      %111 = vector.broadcast %cst_56 : f32 to vector<10x256xf32>
      %112 = arith.maximumf %110, %111 : vector<10x256xf32>
      %c0_57 = arith.constant 0 : index
      %113 = arith.index_cast %c3_i32 : i32 to index
      %c0_58 = arith.constant 0 : index
      %c0_59 = arith.constant 0 : index
      %114 = vector.load %arg5[%c0_57, %113, %c0_58, %c0_59] : memref<1x8x10x256xf32, #tpu.memory_space<vmem>>, vector<1x1x10x256xf32>
      %115 = vector.shape_cast %114 : vector<1x1x10x256xf32> to vector<10x256xf32>
      %116 = vector.shape_cast %112 : vector<10x256xf32> to vector<1x1x10x256xf32>
      tpu.vector_store %arg5[%c0_57, %113, %c0_58, %c0_59], %116 {strides = array<i32>} : memref<1x8x10x256xf32, #tpu.memory_space<vmem>>, vector<1x1x10x256xf32>,
      %c4_i32 = arith.constant 4 : i32
      %c0_60 = arith.constant 0 : index
      %117 = arith.index_cast %c4_i32 : i32 to index
      %c0_61 = arith.constant 0 : index
      %c0_62 = arith.constant 0 : index
      %118 = vector.load %arg5[%c0_60, %117, %c0_61, %c0_62] : memref<1x8x10x256xf32, #tpu.memory_space<vmem>>, vector<1x1x10x256xf32>
      %119 = vector.shape_cast %118 : vector<1x1x10x256xf32> to vector<10x256xf32>
      %120 = vector.broadcast %72 : vector<10x1xf32> to vector<10x256xf32>
      %121 = arith.mulf %119, %120 : vector<10x256xf32>
      %cst_63 = arith.constant 0.000000e+00 : f32
      %122 = vector.broadcast %cst_63 : f32 to vector<10x256xf32>
      %123 = arith.maximumf %121, %122 : vector<10x256xf32>
      %c0_64 = arith.constant 0 : index
      %124 = arith.index_cast %c4_i32 : i32 to index
      %c0_65 = arith.constant 0 : index
      %c0_66 = arith.constant 0 : index
      %125 = vector.load %arg5[%c0_64, %124, %c0_65, %c0_66] : memref<1x8x10x256xf32, #tpu.memory_space<vmem>>, vector<1x1x10x256xf32>
      %126 = vector.shape_cast %125 : vector<1x1x10x256xf32> to vector<10x256xf32>
      %127 = vector.shape_cast %123 : vector<10x256xf32> to vector<1x1x10x256xf32>
      tpu.vector_store %arg5[%c0_64, %124, %c0_65, %c0_66], %127 {strides = array<i32>} : memref<1x8x10x256xf32, #tpu.memory_space<vmem>>, vector<1x1x10x256xf32>,
      %c5_i32 = arith.constant 5 : i32
      %c0_67 = arith.constant 0 : index
      %128 = arith.index_cast %c5_i32 : i32 to index
      %c0_68 = arith.constant 0 : index
      %c0_69 = arith.constant 0 : index
      %129 = vector.load %arg5[%c0_67, %128, %c0_68, %c0_69] : memref<1x8x10x256xf32, #tpu.memory_space<vmem>>, vector<1x1x10x256xf32>
      %130 = vector.shape_cast %129 : vector<1x1x10x256xf32> to vector<10x256xf32>
      %131 = vector.broadcast %72 : vector<10x1xf32> to vector<10x256xf32>
      %132 = arith.mulf %130, %131 : vector<10x256xf32>
      %cst_70 = arith.constant 0.000000e+00 : f32
      %133 = vector.broadcast %cst_70 : f32 to vector<10x256xf32>
      %134 = arith.maximumf %132, %133 : vector<10x256xf32>
      %c0_71 = arith.constant 0 : index
      %135 = arith.index_cast %c5_i32 : i32 to index
      %c0_72 = arith.constant 0 : index
      %c0_73 = arith.constant 0 : index
      %136 = vector.load %arg5[%c0_71, %135, %c0_72, %c0_73] : memref<1x8x10x256xf32, #tpu.memory_space<vmem>>, vector<1x1x10x256xf32>
      %137 = vector.shape_cast %136 : vector<1x1x10x256xf32> to vector<10x256xf32>
      %138 = vector.shape_cast %134 : vector<10x256xf32> to vector<1x1x10x256xf32>
      tpu.vector_store %arg5[%c0_71, %135, %c0_72, %c0_73], %138 {strides = array<i32>} : memref<1x8x10x256xf32, #tpu.memory_space<vmem>>, vector<1x1x10x256xf32>,
      %c6_i32 = arith.constant 6 : i32
      %c0_74 = arith.constant 0 : index
      %139 = arith.index_cast %c6_i32 : i32 to index
      %c0_75 = arith.constant 0 : index
      %c0_76 = arith.constant 0 : index
      %140 = vector.load %arg5[%c0_74, %139, %c0_75, %c0_76] : memref<1x8x10x256xf32, #tpu.memory_space<vmem>>, vector<1x1x10x256xf32>
      %141 = vector.shape_cast %140 : vector<1x1x10x256xf32> to vector<10x256xf32>
      %142 = vector.broadcast %72 : vector<10x1xf32> to vector<10x256xf32>
      %143 = arith.mulf %141, %142 : vector<10x256xf32>
      %cst_77 = arith.constant 0.000000e+00 : f32
      %144 = vector.broadcast %cst_77 : f32 to vector<10x256xf32>
      %145 = arith.maximumf %143, %144 : vector<10x256xf32>
      %c0_78 = arith.constant 0 : index
      %146 = arith.index_cast %c6_i32 : i32 to index
      %c0_79 = arith.constant 0 : index
      %c0_80 = arith.constant 0 : index
      %147 = vector.load %arg5[%c0_78, %146, %c0_79, %c0_80] : memref<1x8x10x256xf32, #tpu.memory_space<vmem>>, vector<1x1x10x256xf32>
      %148 = vector.shape_cast %147 : vector<1x1x10x256xf32> to vector<10x256xf32>
      %149 = vector.shape_cast %145 : vector<10x256xf32> to vector<1x1x10x256xf32>
      tpu.vector_store %arg5[%c0_78, %146, %c0_79, %c0_80], %149 {strides = array<i32>} : memref<1x8x10x256xf32, #tpu.memory_space<vmem>>, vector<1x1x10x256xf32>,
      %c7_i32_81 = arith.constant 7 : i32
      %c0_82 = arith.constant 0 : index
      %150 = arith.index_cast %c7_i32_81 : i32 to index
      %c0_83 = arith.constant 0 : index
      %c0_84 = arith.constant 0 : index
      %151 = vector.load %arg5[%c0_82, %150, %c0_83, %c0_84] : memref<1x8x10x256xf32, #tpu.memory_space<vmem>>, vector<1x1x10x256xf32>
      %152 = vector.shape_cast %151 : vector<1x1x10x256xf32> to vector<10x256xf32>
      %153 = vector.broadcast %72 : vector<10x1xf32> to vector<10x256xf32>
      %154 = arith.mulf %152, %153 : vector<10x256xf32>
      %cst_85 = arith.constant 0.000000e+00 : f32
      %155 = vector.broadcast %cst_85 : f32 to vector<10x256xf32>
      %156 = arith.maximumf %154, %155 : vector<10x256xf32>
      %c0_86 = arith.constant 0 : index
      %157 = arith.index_cast %c7_i32_81 : i32 to index
      %c0_87 = arith.constant 0 : index
      %c0_88 = arith.constant 0 : index
      %158 = vector.load %arg5[%c0_86, %157, %c0_87, %c0_88] : memref<1x8x10x256xf32, #tpu.memory_space<vmem>>, vector<1x1x10x256xf32>
      %159 = vector.shape_cast %158 : vector<1x1x10x256xf32> to vector<10x256xf32>
      %160 = vector.shape_cast %156 : vector<10x256xf32> to vector<1x1x10x256xf32>
      tpu.vector_store %arg5[%c0_86, %157, %c0_87, %c0_88], %160 {strides = array<i32>} : memref<1x8x10x256xf32, #tpu.memory_space<vmem>>, vector<1x1x10x256xf32>,
      %c8_i32 = arith.constant 8 : i32
    } else {
    }
    return
  }
  func.func @transform_0(%arg0: i32, %arg1: i32) -> (i32, i32, i32, i32) {
    %c0_i32 = arith.constant 0 : i32
    %c0_i32_0 = arith.constant 0 : i32
    %c0_i32_1 = arith.constant 0 : i32
    return %arg0, %arg1, %c0_i32, %c0_i32_0 : i32, i32, i32, i32
  }
  func.func @transform_1(%arg0: i32, %arg1: i32) -> (i32, i32) {
    %c0_i32 = arith.constant 0 : i32
    %c0_i32_0 = arith.constant 0 : i32
    %c0_i32_1 = arith.constant 0 : i32
    return %c0_i32, %c0_i32_0 : i32, i32
  }
  func.func @transform_2(%arg0: i32, %arg1: i32) -> (i32, i32) {
    %c0_i32 = arith.constant 0 : i32
    %c0_i32_0 = arith.constant 0 : i32
    %c0_i32_1 = arith.constant 0 : i32
    return %c0_i32, %c0_i32_0 : i32, i32
  }
  func.func @transform_3(%arg0: i32, %arg1: i32) -> (i32, i32, i32, i32) {
    %c0_i32 = arith.constant 0 : i32
    %c0_i32_0 = arith.constant 0 : i32
    %c0_i32_1 = arith.constant 0 : i32
    %c0_i32_2 = arith.constant 0 : i32
    return %arg0, %c0_i32, %c0_i32_0, %c0_i32_1 : i32, i32, i32, i32
  }
}

</mosaic_0001>

<bundles_post_ra>
// kernel: tpu_custom_call.1
= control target key start
LH: loop header
LB: loop body
LE: loop exit
PB: predicated region body
PF: predicated region fallthrough
CT: control target
= control target key end

     0   :  { %s796_s12 = smov 0   ;;  %s798_s13 = smov 0   ;;  %s934_s0 = inlined_call_operand.vmem [shape: f32[2,8,10,256], index: 0, kind: input, shape index: {}]   ;;  %s935_s1 = inlined_call_operand.vmem [shape: f32[10,2], index: 1, kind: input, shape index: {}]   ;;  %s936_s2 = inlined_call_operand.vmem [shape: f32[10,2], index: 2, kind: input, shape index: {}]   ;;  %s937_s3 = inlined_call_operand.vmem [shape: f32[2,8,10,256], index: 3, kind: output, shape index: {}]  }
   0x1   :  { %s800_s14 = smov 0   ;;  %s802_s15 = smov 0  }
   0x2   :  { %s804_s16 = smov 0  }
   0x3 LB: > { %s22_s17 = sadd.s32 1, %s763_s14  ;;  %s25_s18 = sadd.s32 1, %s767_s15  ;;  %s771_s16 = sphi %s804_s16, %s13_s16   ;;  %s767_s15 = sphi %s802_s15, %s941_s15   ;;  %s763_s14 = sphi %s800_s14, %s940_s14   ;;  %s759_s13 = sphi %s798_s13, %s939_s13   ;;  %s755_s12 = sphi %s796_s12, %s938_s12  }
   0x4   : > { %p23_p0 = scmp.ge.s32.totalorder %s22_s17, 8  ;;  %p607_p1 = scmp.ge.s32.totalorder %s771_s16, 1 }
   0x5   : > { %p155_p2 = scmp.lt.s32.totalorder %s771_s16, 17 }
   0x6   : > { %s943_s17 = smov (%p23_p0, %s22_s17), 0  ;;  %s945_s18 = smov (!%p23_p0, %s25_s18), %s767_s15 }
   0x7   : > { %p156_p3 = pnand %p607_p1, %p155_p2  ;;  %p27_p4 = scmp.ge.s32.totalorder %s945_s18, 2 }
   0x8   : > { %p183_p5 = scmp.lt.s32.totalorder (!%p156_p3), %s759_s13, 1  ;;  %p185_p6 = scmp.lt.s32.totalorder (!%p156_p3), %s755_s12, 7 }
   0x9   : > { %s947_s18 = smov (%p27_p4, %s945_s18), 0  ;;  %159 = sbr.rel (%p156_p3) target bundleno = 632 (0x278), region = 32 }
   0xa   : > { %p613_p7 = scmp.ne.s32.totalorder (!%p156_p3), %s755_s12, 0 }
   0xe   : > { %s949_s13 = smov (!%p183_p5, %s759_s13), 1  ;;  %vm204_vm0 = vcmask 1041408  }
   0xf   : > { %s186_s19 = scalar_select %p185_p6, %s755_s12, 7 }
  0x10   : > { %s609_s20 = sshll.u32 %s949_s13, 5  ;;  %s678_s21 = sshll.u32 %s949_s13, 8 }
  0x11   : > { %s608_s22 = sshll.u32 %s186_s19, 2  ;;  %s833_s25 = scalar_lea.vmem %s937_s3, %s678_s21 }
  0x12   : > { %s189_s26 = sadd.s32 %s609_s20, %s608_s22 }
  0x13   : > { %s610_s27 = sshll.u32 %s189_s26, 3 }
  0x14   : > { %s191_s30 = scalar_lea.vmem %s934_s0, %s610_s27 }
  0x15   : > { %v197_v0 = vld [vmem:[%s191_s30] sm:$0xff]  ;;  %v198_v1 = vld [vmem:[%s191_s30 + $0x8] sm:$0xff]  ;;  %v199_v2 = vld [vmem:[%s191_s30 + $0x10] sm:$0x3] }
  0x16   : > { %v210_v3 = vmax.f32 %v197_v0, %v198_v1  ;;  %v201_v4 = vadd.f32 %v198_v1, %v197_v0  ;;  %v200_v5 = vld [vmem:[%s191_s30 + $0x18] sm:$0x3]  ;;  %v213_v6 = vsel %vm204_vm0, %v199_v2, -inf  ;;  %v205_v7 = vsel %vm204_vm0, %v199_v2, 0.0 }
  0x17   : > { %v214_v8 = vsel %vm204_vm0, %v200_v5, -inf  ;;  %v206_v9 = vsel %vm204_vm0, %v200_v5, 0.0 }
  0x18   : > { %211 = vmax.xlane.f32.xlu1 %v210_v3  ;;  %202 = vadd.xlane.f32.xlu0 %v201_v4  ;;  %v215_v10 = vmax.f32 %v213_v6, %v214_v8  ;;  %v207_v11 = vadd.f32 %v206_v9, %v205_v7 }
  0x1c   : > { %216 = vmax.xlane.f32.xlu1 %v215_v10  ;;  %208 = vadd.xlane.f32.xlu0 %v207_v11 }
  0xa1   : > { %v212_v12 = vpop.xlane.xlu1 %211  ;;  %v203_v13 = vpop.xlane.xlu0 %202  ;;  %221 = sbr.rel (%p613_p7) target bundleno = 169 (0xa9), region = 36 }
  0xa5   : > { %v217_v14 = vpop.xlane.xlu1 %216  ;;  %v209_v15 = vpop.xlane.xlu0 %208 }
  0xa6   : > { %vm222_vm1 = vcmask 7168   ;;  %vm224_vm2 = vcmask 1024  }
  0xa7   : > { %223 = vst.msk [vmem:[#allocation2] sm:$0xff] %vm222_vm1, %v203_v13  ;;  %226 = vst.msk [vmem:[#allocation3] sm:$0xff] %vm222_vm1, %v212_v12 }
  0xa8   : > { %225 = vst.msk [vmem:[#allocation2 + $0x8] sm:$0x3] %vm224_vm2, %v209_v15  ;;  %227 = vst.msk [vmem:[#allocation3 + $0x8] sm:$0x3] %vm224_vm2, %v217_v14 }
  0xa9 PF: > { %p614_p8 = scmp.le.s32.totalorder %s755_s12, 0 }
  0xab   : > { %231 = sbr.rel (%p614_p8) target bundleno = 181 (0xb5), region = 40 }
  0xb0   : > { %v232_v16 = vld [vmem:[#allocation2] sm:$0xff]  ;;  %vm236_vm3 = vcmask 7168   ;;  %v233_v17 = vld [vmem:[#allocation2 + $0x8] sm:$0x3]  ;;  %vm238_vm4 = vcmask 1024   ;;  %v240_v18 = vld [vmem:[#allocation3] sm:$0xff] }
  0xb1   : > { %v234_v19 = vadd.f32 %v232_v16, %v203_v13  ;;  %v235_v20 = vadd.f32 %v233_v17, %v209_v15  ;;  %v242_v21 = vmax.f32 %v240_v18, %v212_v12  ;;  %v241_v22 = vld [vmem:[#allocation3 + $0x8] sm:$0x3] }
  0xb2   : > { %v243_v23 = vmax.f32 %v241_v22, %v217_v14 }
  0xb3   : > { %237 = vst.msk [vmem:[#allocation2] sm:$0xff] %vm236_vm3, %v234_v19  ;;  %244 = vst.msk [vmem:[#allocation3] sm:$0xff] %vm236_vm3, %v242_v21 }
  0xb4   : > { %239 = vst.msk [vmem:[#allocation2 + $0x8] sm:$0x3] %vm238_vm4, %v235_v20  ;;  %245 = vst.msk [vmem:[#allocation3 + $0x8] sm:$0x3] %vm238_vm4, %v243_v23 }
  0xb5 PF: > { %s679_s4 = sshll.u32 %s755_s12, 5  ;;  %p617_p9 = scmp.ne.s32.totalorder %s755_s12, 7 }
  0xb6   : > { %s248_s5 = scalar_lea.vmem %s833_s25, %s679_s4  ;;  %s773_s8 = smov (!%p617_p9), 1  }
  0xb7   : > { %249 = vst [vmem:[%s248_s5] sm:$0xff] %v197_v0  ;;  %250 = vst [vmem:[%s248_s5 + $0x8] sm:$0xff] %v198_v1  ;;  %256 = sbr.rel (%p617_p9) target bundleno = 632 (0x278), region = 44  ;;  %s774_s20 = smov (!%p617_p9), 127  }
  0xb8   : > { %251 = vst [vmem:[%s248_s5 + $0x10] sm:$0x3] %v199_v2  ;;  %252 = vst [vmem:[%s248_s5 + $0x18] sm:$0x3] %v200_v5 }
  0xbc   : > { %v265_v24 = vld [vmem:[#allocation3] sm:$0xff]  ;;  %v257_v25 = vld [vmem:[%s935_s1] sm:$0xff]  ;;  %v266_v29 = vld [vmem:[#allocation3 + $0x8] sm:$0x3]  ;;  %vm269_vm5 = vcmask 7168   ;;  %vm271_vm6 = vcmask 1024  }
  0xbd   : > { %v261_v26 = vld [vmem:[#allocation2] sm:$0xff]  ;;  %337 = vrot.lane.b32.xlu1 %v265_v24, %s773_s8  ;;  %v319_v27 = vmul.f32 %v265_v24, %v257_v25  ;;  %v258_v30 = vld [vmem:[%s935_s1 + $0x8] sm:$0x3]  ;;  %vm295_vm7 = vcmask 15368   ;;  %vm297_vm8 = vcmask 9224  }
  0xbe   : > { %v263_v28 = vmul.f32 0.00048828125, %v261_v26  ;;  %v320_v31 = vmul.f32 %v266_v29, %v258_v30  ;;  %v262_v32 = vld [vmem:[#allocation2 + $0x8] sm:$0x3]  ;;  %v259_v8 = vld [vmem:[%s936_s2] sm:$0xff] }
  0xbf   : > { %v321_v33 = vsel %vm269_vm5, %v319_v27, 0.0  ;;  %v264_v35 = vmul.f32 0.00048828125, %v262_v32  ;;  %v260_v7 = vld [vmem:[%s936_s2 + $0x8] sm:$0x3] }
  0xc0   : > { %287 = vrot.lane.b32.xlu0 %v263_v28, %s773_s8  ;;  %v267_v34 = vmul.f32 %v263_v28, %v257_v25  ;;  %v322_v36 = vsel %vm271_vm6, %v320_v31, 0.0 }
  0xc1   : > { %339 = vrot.lane.b32.xlu1 %v266_v29, %s773_s8  ;;  %v323_v38 = vadd.f32 %v322_v36, %v321_v33  ;;  %v268_v39 = vmul.f32 %v264_v35, %v258_v30 }
  0xc2   : > { %v270_v37 = vsel %vm269_vm5, %v267_v34, 0.0 }
  0xc3   : > { %v272_v40 = vsel %vm271_vm6, %v268_v39, 0.0  ;;  %v324_v42 = vrot.slane %v323_v38, 4 }
  0xc4   : > { %289 = vrot.lane.b32.xlu0 %v264_v35, %s773_s8  ;;  %v273_v41 = vadd.f32 %v272_v40, %v270_v37 }
  0xc5   : > { %v325_v48 = vadd.f32 %v324_v42, %v323_v38 }
  0xc6   : > { %v274_v43 = vrot.slane %v273_v41, 4 }
  0xc7   : > { %v326_v59 = vrot.slane %v325_v48, 2 }
  0xc8   : > { %v275_v46 = vadd.f32 %v274_v43, %v273_v41 }
  0xc9   : > { %v327_v0 = vadd.f32 %v326_v59, %v325_v48  ;;  %v647_v59 = vld [vmem:[%s833_s25 + $0x98] sm:$0x3] }
  0xca   : > { %v276_v49 = vrot.slane %v275_v46, 2 }
  0xcb   : > { %v328_v4 = vrot.slane %v327_v0, 1 }
  0xcc   : > { %v277_v54 = vadd.f32 %v276_v49, %v275_v46  ;;  %v383_v49 = vld [vmem:[%s833_s25 + $0x10] sm:$0x3] }
  0xcd   : > { %v329_v11 = vadd.f32 %v328_v4, %v327_v0  ;;  %v670_v4 = vld [vmem:[%s833_s25 + $0xf0] sm:$0x3] }
  0xce   : > { %v278_v58 = vrot.slane %v277_v54, 1 }
  0xcf   : > { %v330_v14 = vmax.f32 %v329_v11, 0.0 }
  0xd0   : > { %v279_v63 = vadd.f32 %v278_v58, %v277_v54  ;;  %v631_v54 = vld [vmem:[%s833_s25 + $0x58] sm:$0x3] }
  0xd1   : > { %v332_v17 = vmul.f32 %v330_v14, %v260_v7  ;;  %v331_v18 = vmul.f32 %v330_v14, %v259_v8 }
  0xd2   : > { %v280_v3 = vmax.f32 %v279_v63, 0.0 }
  0xd4   : > { %v282_v9 = vmul.f32 %v280_v3, %v260_v7  ;;  %v281_v10 = vmul.f32 %v280_v3, %v259_v8  ;;  %v663_v3 = vld [vmem:[%s833_s25 + $0xd8] sm:$0x3] }
 0x12f   : > { %v338_v44 = vpop.permute.xlu1 %337 }
 0x130   : > { %v343_v45 = vmul.f32 %v338_v44, %v257_v25 }
 0x132   : > { %v288_v47 = vpop.permute.xlu0 %287  ;;  %v345_v51 = vsel %vm295_vm7, %v343_v45, 0.0 }
 0x133   : > { %v340_v50 = vpop.permute.xlu1 %339  ;;  %v293_v52 = vmul.f32 %v288_v47, %v257_v25 }
 0x134   : > { %v344_v53 = vmul.f32 %v340_v50, %v258_v30  ;;  %v384_v50 = vld [vmem:[%s833_s25 + $0x18] sm:$0x3] }
 0x135   : > { %v296_v61 = vsel %vm295_vm7, %v293_v52, 0.0  ;;  %v623_v52 = vld [vmem:[%s833_s25 + $0x38] sm:$0x3] }
 0x136   : > { %v290_v55 = vpop.permute.xlu0 %289  ;;  %v346_v56 = vsel %vm297_vm8, %v344_v53, 0.0  ;;  %v630_v53 = vld [vmem:[%s833_s25 + $0x50] sm:$0x3] }
 0x137   : > { %v294_v57 = vmul.f32 %v290_v55, %v258_v30  ;;  %v347_v60 = vadd.f32 %v346_v56, %v345_v51  ;;  %v775_v30 = vmov 0   ;;  %v622_v51 = vld [vmem:[%s833_s25 + $0x30] sm:$0x3]  ;;  %v639_v56 = vld [vmem:[%s833_s25 + $0x78] sm:$0x3] }
 0x138   : > { %724 = vset.pattern.permute.xlu1 %v775_v30  ;;  %723 = vset.pattern.permute.xlu0 %v775_v30  ;;  %v638_v55 = vld [vmem:[%s833_s25 + $0x70] sm:$0x3]  ;;  %v628_v30 = vld [vmem:[%s833_s25 + $0x40] sm:$0xff] }
 0x139   : > { %v298_v62 = vsel %vm297_vm8, %v294_v57, 0.0  ;;  %v348_v1 = vrot.slane %v347_v60, 4  ;;  %v646_v57 = vld [vmem:[%s833_s25 + $0x90] sm:$0x3] }
 0x13a   : > { %v299_v2 = vadd.f32 %v298_v62, %v296_v61  ;;  %v655_v61 = vld [vmem:[%s833_s25 + $0xb8] sm:$0x3] }
 0x13b   : > { %v349_v5 = vadd.f32 %v348_v1, %v347_v60  ;;  %v654_v60 = vld [vmem:[%s833_s25 + $0xb0] sm:$0x3] }
 0x13c   : > { %v300_v6 = vrot.slane %v299_v2, 4 }
 0x13d   : > { %v350_v12 = vrot.slane %v349_v5, 2 }
 0x13e   : > { %v301_v13 = vadd.f32 %v300_v6, %v299_v2  ;;  %v662_v2 = vld [vmem:[%s833_s25 + $0xd0] sm:$0x3] }
 0x13f   : > { %v351_v15 = vadd.f32 %v350_v12, %v349_v5 }
 0x140   : > { %v302_v16 = vrot.slane %v301_v13, 2 }
 0x141   : > { %v352_v20 = vrot.slane %v351_v15, 1 }
 0x142   : > { %v303_v19 = vadd.f32 %v302_v16, %v301_v13 }
 0x143   : > { %v353_v23 = vadd.f32 %v352_v20, %v351_v15 }
 0x144   : > { %v304_v21 = vrot.slane %v303_v19, 1 }
 0x145   : > { %v354_v27 = vmax.f32 %v353_v23, 0.0  ;;  %v382_v23 = vld [vmem:[%s833_s25 + $0x8] sm:$0xff] }
 0x146   : > { %v305_v22 = vadd.f32 %v304_v21, %v303_v19 }
 0x147   : > { %v356_v28 = vmul.f32 %v354_v27, %v260_v7  ;;  %v355_v29 = vmul.f32 %v354_v27, %v259_v8 }
 0x148   : > { %v306_v24 = vmax.f32 %v305_v22, 0.0  ;;  %v381_v22 = vld [vmem:[%s833_s25] sm:$0xff] }
 0x14a   : > { %v308_v25 = vmul.f32 %v306_v24, %v260_v7  ;;  %v307_v26 = vmul.f32 %v306_v24, %v259_v8  ;;  %v620_v24 = vld [vmem:[%s833_s25 + $0x20] sm:$0xff] }
 0x14c   : > { %313 = vrot.lane.b32.xlu1 %v308_v25, %s774_s20  ;;  %311 = vrot.lane.b32.xlu0 %v307_v26, %s774_s20 }
 0x150   : > { %361 = vrot.lane.b32.xlu1 %v356_v28, %s774_s20  ;;  %359 = vrot.lane.b32.xlu0 %v355_v29, %s774_s20  ;;  %v621_v29 = vld [vmem:[%s833_s25 + $0x28] sm:$0xff] }
 0x1be   : > { %v314_v31 = vpop.permute.xlu1 %313  ;;  %v312_v32 = vpop.permute.xlu0 %311 }
 0x1bf   : > { %v318_v35 = vadd.f32 %v314_v31, %v282_v9  ;;  %v317_v36 = vadd.f32 %v312_v32, %v281_v10  ;;  %v671_v9 = vld [vmem:[%s833_s25 + $0xf8] sm:$0x3]  ;;  %v629_v31 = vld [vmem:[%s833_s25 + $0x48] sm:$0xff] }
 0x1c2   : > { %v362_v33 = vpop.permute.xlu1 %361  ;;  %v360_v34 = vpop.permute.xlu0 %359 }
 0x1c3   : > { %v366_v37 = vadd.f32 %v362_v33, %v332_v17  ;;  %v365_v38 = vadd.f32 %v360_v34, %v331_v18 }
 0x1c5   : > { %v368_v39 = vadd.f32 %v366_v37, %v318_v35  ;;  %v367_v40 = vadd.f32 %v365_v38, %v317_v36  ;;  %v636_v37 = vld [vmem:[%s833_s25 + $0x60] sm:$0xff]  ;;  %v637_v38 = vld [vmem:[%s833_s25 + $0x68] sm:$0xff] }
 0x1c7   : > { %v619_v41 = vmul.f32 -1.442695, %v368_v39  ;;  %v618_v42 = vmul.f32 -1.442695, %v367_v40 }
 0x1c9   : > { %725 = vpow2.f32 %v619_v41 }
 0x1ca   : > { %727 = vpow2.f32 %v618_v42 }
 0x1d6   : > { %v726_v43 = vpop.eup %725 }
 0x1d7   : > { %v728_v44 = vpop.eup %727  ;;  %v376_v45 = vadd.f32 1.0, %v726_v43  ;;  %v644_v43 = vld [vmem:[%s833_s25 + $0x80] sm:$0xff] }
 0x1d8   : > { %v375_v46 = vadd.f32 1.0, %v728_v44  ;;  %v645_v44 = vld [vmem:[%s833_s25 + $0x88] sm:$0xff] }
 0x1d9   : > { %729 = vrcp.f32 %v376_v45  ;;  %v652_v45 = vld [vmem:[%s833_s25 + $0xa0] sm:$0xff] }
 0x1da   : > { %731 = vrcp.f32 %v375_v46 }
 0x1e6   : > { %v730_v47 = vpop.eup %729 }
 0x1e7   : > { %v732_v48 = vpop.eup %731  ;;  %392 = vperm.xlu1 %724, %v730_v47  }
 0x1e8   : > { %387 = vperm.xlu0 %723, %v732_v48  }
 0x262   : > { %v393_v58 = vpop.permute.xlu1 %392 }
 0x263   : > { %v397_v62 = vmul.f32 %v393_v58, %v383_v49  ;;  %v398_v63 = vmul.f32 %v393_v58, %v384_v50  ;;  %v414_v0 = vmul.f32 %v622_v51, %v393_v58  ;;  %v415_v1 = vmul.f32 %v623_v52, %v393_v58  ;;  %v388_v32 = vpop.permute.xlu0 %387  ;;  %v653_v50 = vld [vmem:[%s833_s25 + $0xa8] sm:$0xff]  ;;  %v660_v51 = vld [vmem:[%s833_s25 + $0xc0] sm:$0xff] }
 0x264   : > { %v431_v5 = vmul.f32 %v630_v53, %v393_v58  ;;  %v432_v6 = vmul.f32 %v631_v54, %v393_v58  ;;  %v448_v7 = vmul.f32 %v638_v55, %v393_v58  ;;  %v449_v8 = vmul.f32 %v639_v56, %v393_v58  ;;  %v661_v52 = vld [vmem:[%s833_s25 + $0xc8] sm:$0xff] }
 0x265   : > { %v401_v10 = vmax.f32 %v397_v62, 0.0  ;;  %v402_v11 = vmax.f32 %v398_v63, 0.0  ;;  %v418_v12 = vmax.f32 %v414_v0, 0.0  ;;  %v419_v13 = vmax.f32 %v415_v1, 0.0 }
 0x266   : > { %v435_v14 = vmax.f32 %v431_v5, 0.0  ;;  %v436_v15 = vmax.f32 %v432_v6, 0.0  ;;  %v452_v16 = vmax.f32 %v448_v7, 0.0  ;;  %v453_v17 = vmax.f32 %v449_v8, 0.0 }
 0x267   : > { %405 = vst [vmem:[%s833_s25 + $0x10] sm:$0x3] %v401_v10  ;;  %406 = vst [vmem:[%s833_s25 + $0x18] sm:$0x3] %v402_v11  ;;  %v465_v18 = vmul.f32 %v646_v57, %v393_v58  ;;  %v466_v19 = vmul.f32 %v647_v59, %v393_v58  ;;  %v482_v20 = vmul.f32 %v654_v60, %v393_v58  ;;  %v668_v57 = vld [vmem:[%s833_s25 + $0xe0] sm:$0xff] }
 0x268   : > { %626 = vst [vmem:[%s833_s25 + $0x30] sm:$0x3] %v418_v12  ;;  %627 = vst [vmem:[%s833_s25 + $0x38] sm:$0x3] %v419_v13  ;;  %v483_v21 = vmul.f32 %v655_v61, %v393_v58  ;;  %v499_v25 = vmul.f32 %v662_v2, %v393_v58  ;;  %v500_v26 = vmul.f32 %v663_v3, %v393_v58 }
 0x269   : > { %634 = vst [vmem:[%s833_s25 + $0x50] sm:$0x3] %v435_v14  ;;  %635 = vst [vmem:[%s833_s25 + $0x58] sm:$0x3] %v436_v15  ;;  %v516_v27 = vmul.f32 %v670_v4, %v393_v58  ;;  %v517_v28 = vmul.f32 %v671_v9, %v393_v58  ;;  %v469_v33 = vmax.f32 %v465_v18, 0.0  ;;  %v470_v34 = vmax.f32 %v466_v19, 0.0 }
 0x26a   : > { %642 = vst [vmem:[%s833_s25 + $0x70] sm:$0x3] %v452_v16  ;;  %643 = vst [vmem:[%s833_s25 + $0x78] sm:$0x3] %v453_v17  ;;  %v486_v35 = vmax.f32 %v482_v20, 0.0  ;;  %v487_v36 = vmax.f32 %v483_v21, 0.0  ;;  %v395_v46 = vmul.f32 %v388_v32, %v381_v22  ;;  %v396_v47 = vmul.f32 %v388_v32, %v382_v23 }
 0x26b   : > { %v503_v39 = vmax.f32 %v499_v25, 0.0  ;;  %v504_v40 = vmax.f32 %v500_v26, 0.0  ;;  %v520_v41 = vmax.f32 %v516_v27, 0.0  ;;  %v521_v42 = vmax.f32 %v517_v28, 0.0  ;;  %650 = vst [vmem:[%s833_s25 + $0x90] sm:$0x3] %v469_v33 }
 0x26c   : > { %651 = vst [vmem:[%s833_s25 + $0x98] sm:$0x3] %v470_v34  ;;  %658 = vst [vmem:[%s833_s25 + $0xb0] sm:$0x3] %v486_v35  ;;  %v412_v48 = vmul.f32 %v620_v24, %v388_v32  ;;  %v413_v49 = vmul.f32 %v621_v29, %v388_v32  ;;  %v429_v53 = vmul.f32 %v628_v30, %v388_v32  ;;  %v669_v58 = vld [vmem:[%s833_s25 + $0xe8] sm:$0xff]  ;;  %v399_v59 = vmax.f32 %v395_v46, 0.0 }
 0x26d   : > { %659 = vst [vmem:[%s833_s25 + $0xb8] sm:$0x3] %v487_v36  ;;  %666 = vst [vmem:[%s833_s25 + $0xd0] sm:$0x3] %v503_v39  ;;  %v430_v54 = vmul.f32 %v629_v31, %v388_v32  ;;  %v446_v55 = vmul.f32 %v636_v37, %v388_v32  ;;  %v447_v56 = vmul.f32 %v637_v38, %v388_v32  ;;  %v400_v60 = vmax.f32 %v396_v47, 0.0 }
 0x26e   : > { %667 = vst [vmem:[%s833_s25 + $0xd8] sm:$0x3] %v504_v40  ;;  %674 = vst [vmem:[%s833_s25 + $0xf0] sm:$0x3] %v520_v41  ;;  %v416_v61 = vmax.f32 %v412_v48, 0.0  ;;  %v417_v62 = vmax.f32 %v413_v49, 0.0  ;;  %v463_v3 = vmul.f32 %v644_v43, %v388_v32  ;;  %v464_v4 = vmul.f32 %v645_v44, %v388_v32 }
 0x26f   : > { %675 = vst [vmem:[%s833_s25 + $0xf8] sm:$0x3] %v521_v42  ;;  %v433_v63 = vmax.f32 %v429_v53, 0.0  ;;  %v434_v0 = vmax.f32 %v430_v54, 0.0  ;;  %v450_v1 = vmax.f32 %v446_v55, 0.0  ;;  %v451_v2 = vmax.f32 %v447_v56, 0.0  ;;  %403 = vst [vmem:[%s833_s25] sm:$0xff] %v399_v59 }
 0x270   : > { %404 = vst [vmem:[%s833_s25 + $0x8] sm:$0xff] %v400_v60  ;;  %624 = vst [vmem:[%s833_s25 + $0x20] sm:$0xff] %v416_v61  ;;  %v480_v5 = vmul.f32 %v652_v45, %v388_v32  ;;  %v481_v6 = vmul.f32 %v653_v50, %v388_v32  ;;  %v497_v7 = vmul.f32 %v660_v51, %v388_v32  ;;  %v467_v11 = vmax.f32 %v463_v3, 0.0 }
 0x271   : > { %625 = vst [vmem:[%s833_s25 + $0x28] sm:$0xff] %v417_v62  ;;  %632 = vst [vmem:[%s833_s25 + $0x40] sm:$0xff] %v433_v63  ;;  %v498_v8 = vmul.f32 %v661_v52, %v388_v32  ;;  %v514_v9 = vmul.f32 %v668_v57, %v388_v32  ;;  %v515_v10 = vmul.f32 %v669_v58, %v388_v32  ;;  %v468_v12 = vmax.f32 %v464_v4, 0.0 }
 0x272   : > { %633 = vst [vmem:[%s833_s25 + $0x48] sm:$0xff] %v434_v0  ;;  %640 = vst [vmem:[%s833_s25 + $0x60] sm:$0xff] %v450_v1  ;;  %v484_v13 = vmax.f32 %v480_v5, 0.0  ;;  %v485_v14 = vmax.f32 %v481_v6, 0.0  ;;  %v501_v15 = vmax.f32 %v497_v7, 0.0 }
 0x273   : > { %641 = vst [vmem:[%s833_s25 + $0x68] sm:$0xff] %v451_v2  ;;  %v502_v16 = vmax.f32 %v498_v8, 0.0  ;;  %v518_v17 = vmax.f32 %v514_v9, 0.0  ;;  %v519_v18 = vmax.f32 %v515_v10, 0.0  ;;  %648 = vst [vmem:[%s833_s25 + $0x80] sm:$0xff] %v467_v11 }
 0x274   : > { %649 = vst [vmem:[%s833_s25 + $0x88] sm:$0xff] %v468_v12  ;;  %656 = vst [vmem:[%s833_s25 + $0xa0] sm:$0xff] %v484_v13 }
 0x275   : > { %657 = vst [vmem:[%s833_s25 + $0xa8] sm:$0xff] %v485_v14  ;;  %664 = vst [vmem:[%s833_s25 + $0xc0] sm:$0xff] %v501_v15 }
 0x276   : > { %665 = vst [vmem:[%s833_s25 + $0xc8] sm:$0xff] %v502_v16  ;;  %672 = vst [vmem:[%s833_s25 + $0xe0] sm:$0xff] %v518_v17 }
 0x277   : > { %673 = vst [vmem:[%s833_s25 + $0xe8] sm:$0xff] %v519_v18 }
 0x278 PF: > { %s13_s16 = sadd.s32 1, %s771_s16   ;;  %s938_s12 = smov %s763_s14 }
 0x279   : > { %p10_p10 = scmp.ge.s32.totalorder %s13_s16, 18   ;;  %s939_s13 = smov %s767_s15 }
 0x27a   : > { %s940_s14 = smov %s943_s17  ;;  %s941_s15 = smov %s947_s18 }
 0x27b   :  { %12 = sbr.rel (!%p10_p10) target bundleno = 3 (0x3), region = 82 }

</bundles_post_ra>
